<compile_context>
chip_gen: v7x
topology: tpu7x:2x2x1
jax: 0.10.0
libtpu: 0.0.40
codegen_flags: <defaults>
</compile_context>

<pallas_src>
import functools
import math

import jax
import jax.numpy as jnp
from jax.experimental import pallas as pl
from jax.experimental.pallas import tpu as pltpu


_MAX_FOLD_LANES = 512          # cap for the lcm-folded lane width L
_MAX_FLAT_SEG_ELEMS = 256 * 1024  # cap on (C*T)*T for the small-T seg matrices
_HIGHEST = jax.lax.Precision.HIGHEST
_DEFAULT = jax.lax.Precision.DEFAULT


# --------------------------- hardware budgets ------------------------------ #

@functools.lru_cache(maxsize=None)
def _hw_budget():
    """Returns (target_tile_f32_bytes, vmem_limit_bytes, min_grid_steps)."""
    vmem_cap = None
    try:
        vmem_cap = int(pltpu.get_tpu_info().vmem_capacity_bytes)
    except Exception:
        vmem_cap = None
    if vmem_cap is not None and vmem_cap >= 128 * 1024 * 1024:
        # v5e / v6e: 128 MiB VMEM, 1 TensorCore per chip.
        return 8 * 1024 * 1024, 96 * 1024 * 1024, 1
    if vmem_cap is not None:
        # v7x-class: 64 MiB VMEM, 2 TensorCores; tighter budget, >=2 grid steps
        # so both cores get work (double-buffered in/out + f32 intermediates
        # must fit under the limit).
        return 4 * 1024 * 1024, min(48 * 1024 * 1024, (vmem_cap * 3) // 4), 2
    # Unknown (interpret mode / old runtime): conservative defaults.
    return 4 * 1024 * 1024, 48 * 1024 * 1024, 1


def _sublane_multiple(dtype):
    # 8 for f32, 16 for bf16, 32 for int8 (packed sublane tiling minimum).
    return max(8, 32 // jnp.dtype(dtype).itemsize)


def _pick_row_tile(rows, lane_width, dtype, target_bytes, min_steps):
    """Row tile for a (rows, lane_width) layout; sized by f32 footprint."""
    mult = _sublane_multiple(dtype)
    bytes_per_row = max(lane_width, 1) * 4               # f32 footprint
    tile = max(mult, (target_bytes // bytes_per_row) // mult * mult)
    if tile >= rows:
        tile = int(rows)                                  # full-extent block
    if min_steps > 1 and tile >= rows and rows >= 2 * mult:
        # Keep >= 2 grid steps on multi-TensorCore parts.
        tile = max(mult, ((rows // 2) // mult) * mult)
    return int(tile)


def _pick_bct_tiles(B, C, T, dtype, target_bytes, min_steps):
    """(b_tile, t_tile) for (B, C, T) blocks of shape (b_tile, C, t_tile)."""
    del dtype  # sized by f32 footprint
    bytes_per_col = max(C, 1) * 4
    t_tile = max(128, (target_bytes // bytes_per_col) // 128 * 128)
    if t_tile >= T:
        t_tile = int(T)                                   # full-extent block
    per_batch = max(C * t_tile * 4, 1)
    b_tile = int(min(B, max(1, target_bytes // per_batch)))
    if min_steps > 1 and pl.cdiv(B, b_tile) * pl.cdiv(T, t_tile) < min_steps:
        if b_tile > 1:
            b_tile = max(1, b_tile // 2)
        elif t_tile == T and T >= 256:
            t_tile = max(128, ((T // 2) // 128) * 128)
    return int(b_tile), int(t_tile)


# ----------------------------- channels_last ------------------------------- #

def _ln_last_kernel(x_ref, w_ref, b_ref, o_ref, *, inv_c, eps):
    # Plain path (C already lane-dense): x_ref (R, C); w_ref/b_ref (1, C) f32.
    x = x_ref[...].astype(jnp.float32)
    mean = jnp.sum(x, axis=-1, keepdims=True) * inv_c
    xc = x - mean
    var = jnp.sum(xc * xc, axis=-1, keepdims=True) * inv_c
    inv = jax.lax.rsqrt(var + eps)
    o_ref[...] = (xc * inv * w_ref[...] + b_ref[...]).astype(o_ref.dtype)


def _ln_last_fold_kernel(x_ref, w_ref, b_ref, p_ref, s_ref, st_ref, o_ref, *,
                         eps, precision):
    # Lane-folded path: each folded row packs G = L // C logical rows.
    #   x_ref : (R, L)      w_ref/b_ref : (1, L) f32
    #   p_ref : (L, L) = onehot @ onehot.T * (1/C)   (mean broadcast in 1 dot)
    #   s_ref : (L, G) = onehot * (1/C)              (per-segment biased var)
    #   st_ref: (G, L) = onehot.T                    (broadcast back)
    x = x_ref[...].astype(jnp.float32)
    mean_b = jnp.dot(x, p_ref[...], preferred_element_type=jnp.float32,
                     precision=precision)                 # (R, L)
    xc = x - mean_b
    var = jnp.dot(xc * xc, s_ref[...], preferred_element_type=jnp.float32,
                  precision=precision)                    # (R, G)
    inv = jax.lax.rsqrt(var + eps)                        # (R, G)
    inv_b = jnp.dot(inv, st_ref[...], preferred_element_type=jnp.float32,
                    precision=precision)                  # (R, L)
    o_ref[...] = (xc * inv_b * w_ref[...] + b_ref[...]).astype(o_ref.dtype)


def layer_norm_channels_last(x, weight, bias, eps=1e-6):
    """x: (B, T, C); normalize over C. Returns same shape/dtype as x."""
    B, T, C = x.shape
    rows = B * T
    x2 = x.reshape(rows, C)
    eps = float(eps)
    inv_c = 1.0 / C
    target_bytes, vmem_limit, min_steps = _hw_budget()
    precision = _HIGHEST if x.dtype == jnp.float32 else _DEFAULT
    w32 = weight.astype(jnp.float32)
    b32 = bias.astype(jnp.float32)

    L = (C * 128) // math.gcd(C, 128)                     # lcm(C, 128)
    fold = (C < 128) and (L <= _MAX_FOLD_LANES)
    if fold:
        G = L // C
        pad = (-rows) % G
        x2p = jnp.pad(x2, ((0, pad), (0, 0))) if pad else x2
        rows_p = rows + pad
        rows_f = rows_p // G
        xf = x2p.reshape(rows_f, L)                       # free reshape
        w_lane = jnp.tile(w32, G).reshape(1, L)
        b_lane = jnp.tile(b32, G).reshape(1, L)
        seg = jnp.arange(L, dtype=jnp.int32) // C
        onehot = (seg[:, None] == jnp.arange(G, dtype=jnp.int32)[None, :]
                  ).astype(jnp.float32)                   # (L, G)
        s_mat = onehot * jnp.float32(inv_c)               # (L, G)
        st_mat = onehot.T                                 # (G, L)
        p_mat = jnp.dot(s_mat, st_mat, precision=_HIGHEST)  # (L, L)

        row_tile = _pick_row_tile(rows_f, L, x.dtype, target_bytes, min_steps)
        out = pl.pallas_call(
            functools.partial(_ln_last_fold_kernel, eps=eps, precision=precision),
            out_shape=jax.ShapeDtypeStruct((rows_f, L), x.dtype),
            grid_spec=pltpu.PrefetchScalarGridSpec(
                num_scalar_prefetch=0,
                grid=(pl.cdiv(rows_f, row_tile),),
                in_specs=[
                    pl.BlockSpec((row_tile, L), lambda i: (i, 0)),
                    pl.BlockSpec((1, L), lambda i: (0, 0)),
                    pl.BlockSpec((1, L), lambda i: (0, 0)),
                    pl.BlockSpec((L, L), lambda i: (0, 0)),
                    pl.BlockSpec((L, G), lambda i: (0, 0)),
                    pl.BlockSpec((G, L), lambda i: (0, 0)),
                ],
                out_specs=pl.BlockSpec((row_tile, L), lambda i: (i, 0)),
            ),
            compiler_params=pltpu.CompilerParams(
                dimension_semantics=("parallel",),
                vmem_limit_bytes=vmem_limit),
        )(xf, w_lane, b_lane, p_mat, s_mat, st_mat)
        out = out.reshape(rows_p, C)
        if pad:
            out = out[:rows]
        return out.reshape(B, T, C)

    # Plain path (C >= 128, or C that does not fold compactly).
    row_tile = _pick_row_tile(rows, C, x.dtype, target_bytes, min_steps)
    out = pl.pallas_call(
        functools.partial(_ln_last_kernel, inv_c=inv_c, eps=eps),
        out_shape=jax.ShapeDtypeStruct((rows, C), x.dtype),
        grid_spec=pltpu.PrefetchScalarGridSpec(
            num_scalar_prefetch=0,
            grid=(pl.cdiv(rows, row_tile),),
            in_specs=[
                pl.BlockSpec((row_tile, C), lambda i: (i, 0)),
                pl.BlockSpec((1, C), lambda i: (0, 0)),
                pl.BlockSpec((1, C), lambda i: (0, 0)),
            ],
            out_specs=pl.BlockSpec((row_tile, C), lambda i: (i, 0)),
        ),
        compiler_params=pltpu.CompilerParams(
            dimension_semantics=("parallel",),
            vmem_limit_bytes=vmem_limit),
    )(x2, w32.reshape(1, C), b32.reshape(1, C))
    return out.reshape(B, T, C)


# ----------------------------- channels_first ------------------------------ #

def _ln_first_kernel(x_ref, w_ref, b_ref, o_ref, *, inv_c, eps):
    # General path: x_ref (Bt, C, Tt); w_ref/b_ref (1, C, 1) f32. Reduce axis 1.
    x = x_ref[...].astype(jnp.float32)
    mean = jnp.sum(x, axis=1, keepdims=True) * inv_c
    xc = x - mean
    var = jnp.sum(xc * xc, axis=1, keepdims=True) * inv_c
    inv = jax.lax.rsqrt(var + eps)
    o_ref[...] = (w_ref[...] * (xc * inv) + b_ref[...]).astype(o_ref.dtype)


def _ln_first_flat_kernel(x_ref, w_ref, b_ref, s_ref, st_ref, o_ref, *,
                          eps, precision):
    # Small-T path on the flattened (B, C*T) view (lane-dense loads/stores).
    #   x_ref : (Bt, CT)   w_ref/b_ref : (1, CT) f32 (weight repeated over T)
    #   s_ref : (CT, T) = onehot(t) * (1/C)   st_ref : (T, CT) = onehot(t).T
    x = x_ref[...].astype(jnp.float32)
    mean = jnp.dot(x, s_ref[...], preferred_element_type=jnp.float32,
                   precision=precision)                   # (Bt, T)
    mean_b = jnp.dot(mean, st_ref[...], preferred_element_type=jnp.float32,
                     precision=precision)                 # (Bt, CT)
    xc = x - mean_b
    var = jnp.dot(xc * xc, s_ref[...], preferred_element_type=jnp.float32,
                  precision=precision)                    # (Bt, T)
    inv = jax.lax.rsqrt(var + eps)
    inv_b = jnp.dot(inv, st_ref[...], preferred_element_type=jnp.float32,
                    precision=precision)                  # (Bt, CT)
    o_ref[...] = (w_ref[...] * (xc * inv_b) + b_ref[...]).astype(o_ref.dtype)


def layer_norm_channels_first(x, weight, bias, eps=1e-6):
    """x: (B, C, T); normalize over C (axis 1). Returns same shape/dtype."""
    B, C, T = x.shape
    eps = float(eps)
    inv_c = 1.0 / C
    target_bytes, vmem_limit, min_steps = _hw_budget()
    w32 = weight.astype(jnp.float32)
    b32 = bias.astype(jnp.float32)

    CT = C * T
    # Small-T case: a (.., C, T<128) output block would use masked partial
    # stores; route through the flattened lane-dense segmented-matmul kernel
    # (free reshape — same row-major layout) when the seg matrices are small.
    if (T < 128) and (CT * T <= _MAX_FLAT_SEG_ELEMS):
        precision = _HIGHEST if x.dtype == jnp.float32 else _DEFAULT
        x2 = x.reshape(B, CT)
        w_flat = jnp.repeat(w32, T).reshape(1, CT)
        b_flat = jnp.repeat(b32, T).reshape(1, CT)
        tcol = jnp.arange(CT, dtype=jnp.int32) % T
        onehot = (tcol[:, None] == jnp.arange(T, dtype=jnp.int32)[None, :]
                  ).astype(jnp.float32)                   # (CT, T)
        s_mat = onehot * jnp.float32(inv_c)
        st_mat = onehot.T                                 # (T, CT)

        b_tile = _pick_row_tile(B, CT, x.dtype, target_bytes, min_steps)
        out = pl.pallas_call(
            functools.partial(_ln_first_flat_kernel, eps=eps, precision=precision),
            out_shape=jax.ShapeDtypeStruct((B, CT), x.dtype),
            grid_spec=pltpu.PrefetchScalarGridSpec(
                num_scalar_prefetch=0,
                grid=(pl.cdiv(B, b_tile),),
                in_specs=[
                    pl.BlockSpec((b_tile, CT), lambda i: (i, 0)),
                    pl.BlockSpec((1, CT), lambda i: (0, 0)),
                    pl.BlockSpec((1, CT), lambda i: (0, 0)),
                    pl.BlockSpec((CT, T), lambda i: (0, 0)),
                    pl.BlockSpec((T, CT), lambda i: (0, 0)),
                ],
                out_specs=pl.BlockSpec((b_tile, CT), lambda i: (i, 0)),
            ),
            compiler_params=pltpu.CompilerParams(
                dimension_semantics=("parallel",),
                vmem_limit_bytes=vmem_limit),
        )(x2, w_flat, b_flat, s_mat, st_mat)
        return out.reshape(B, C, T)

    # General path: batch + T tiling so every grid step moves multi-MiB.
    b_tile, t_tile = _pick_bct_tiles(B, C, T, x.dtype, target_bytes, min_steps)
    out = pl.pallas_call(
        functools.partial(_ln_first_kernel, inv_c=inv_c, eps=eps),
        out_shape=jax.ShapeDtypeStruct((B, C, T), x.dtype),
        grid_spec=pltpu.PrefetchScalarGridSpec(
            num_scalar_prefetch=0,
            grid=(pl.cdiv(B, b_tile), pl.cdiv(T, t_tile)),
            in_specs=[
                pl.BlockSpec((b_tile, C, t_tile), lambda b, t: (b, 0, t)),
                pl.BlockSpec((1, C, 1), lambda b, t: (0, 0, 0)),
                pl.BlockSpec((1, C, 1), lambda b, t: (0, 0, 0)),
            ],
            out_specs=pl.BlockSpec((b_tile, C, t_tile), lambda b, t: (b, 0, t)),
        ),
        compiler_params=pltpu.CompilerParams(
            dimension_semantics=("parallel", "parallel"),
            vmem_limit_bytes=vmem_limit),
    )(x, w32.reshape(1, C, 1), b32.reshape(1, C, 1))
    return out


# ------------------------------- references -------------------------------- #

def _ref_channels_last(x, w, b, eps):
    xf = x.astype(jnp.float32)
    mean = jnp.mean(xf, axis=-1, keepdims=True)
    var = jnp.mean((xf - mean) ** 2, axis=-1, keepdims=True)
    return ((xf - mean) / jnp.sqrt(var + eps) * w + b).astype(x.dtype)


def _ref_channels_first(x, w, b, eps):
    xf = x.astype(jnp.float32)
    mean = jnp.mean(xf, axis=1, keepdims=True)
    var = jnp.mean((xf - mean) ** 2, axis=1, keepdims=True)
    y = (xf - mean) / jnp.sqrt(var + eps)
    return (w[None, :, None] * y + b[None, :, None]).astype(x.dtype)


# ---------------------------------- main ------------------------------------ #

if __name__ == "__main__":
    key = jax.random.PRNGKey(0)
    k1, k2, k3, k4, k5, k6 = jax.random.split(key, 6)
    eps = 1e-6

    # channels_last, C=32 (lane-folded path, rows divisible by G)
    B, T, C = 2, 8, 32
    weight = 1.0 + 0.1 * jax.random.normal(k3, (C,), dtype=jnp.float32)
    bias = 0.1 * jax.random.normal(k4, (C,), dtype=jnp.float32)
    x_last = jax.random.normal(k1, (B, T, C), dtype=jnp.float32)
    y_last = layer_norm_channels_last(x_last, weight, bias, eps)
    jax.block_until_ready(y_last)
    assert y_last.shape == x_last.shape and y_last.dtype == x_last.dtype
    assert jnp.allclose(y_last, _ref_channels_last(x_last, weight, bias, eps),
                        atol=1e-5, rtol=1e-5), "channels_last (fold) mismatch"

    # channels_last, C=48 (lcm fold L=384, ragged row count -> padded)
    C3 = 48
    w3 = 1.0 + 0.05 * jnp.sin(jnp.arange(C3, dtype=jnp.float32))
    b3 = 0.05 * jnp.cos(jnp.arange(C3, dtype=jnp.float32))
    x3 = jax.random.normal(k6, (3, 7, C3), dtype=jnp.float32)   # rows=21, G=8
    y3 = layer_norm_channels_last(x3, w3, b3, eps)
    jax.block_until_ready(y3)
    assert jnp.allclose(y3, _ref_channels_last(x3, w3, b3, eps),
                        atol=1e-5, rtol=1e-5), "channels_last (lcm fold) mismatch"

    # channels_last, C=128 (plain lane-dense path)
    C2 = 128
    w2 = 1.0 + 0.1 * jax.random.normal(k5, (C2,), dtype=jnp.float32)
    b2 = 0.05 * jnp.cos(jnp.arange(C2, dtype=jnp.float32))
    x_last2 = jax.random.normal(k2, (B, T, C2), dtype=jnp.float32)
    y_last2 = layer_norm_channels_last(x_last2, w2, b2, eps)
    jax.block_until_ready(y_last2)
    assert jnp.allclose(y_last2, _ref_channels_last(x_last2, w2, b2, eps),
                        atol=1e-5, rtol=1e-5), "channels_last (plain) mismatch"

    # channels_first, T=16 < 128 (flattened lane-dense segmented path)
    x_first = jax.random.normal(k2, (B, C, 16), dtype=jnp.float32)
    y_first = layer_norm_channels_first(x_first, weight, bias, eps)
    jax.block_until_ready(y_first)
    assert jnp.allclose(y_first, _ref_channels_first(x_first, weight, bias, eps),
                        atol=1e-5, rtol=1e-5), "channels_first (flat) mismatch"

    # channels_first, T=256 (general batch+T tiled path)
    x_first2 = jax.random.normal(k5, (B, C, 256), dtype=jnp.float32)
    y_first2 = layer_norm_channels_first(x_first2, weight, bias, eps)
    jax.block_until_ready(y_first2)
    assert jnp.allclose(y_first2, _ref_channels_first(x_first2, weight, bias, eps),
                        atol=1e-5, rtol=1e-5), "channels_first (general) mismatch"

    print("KERNEL_OK")
</pallas_src>

<mosaic_0001>
module attributes {stable_mosaic.version = 11 : i64} {
  func.func @_ln_last_fold_kernel(%arg0: i32, %arg1: memref<4x128xf32, #tpu.memory_space<vmem>>, %arg2: memref<1x128xf32, #tpu.memory_space<vmem>>, %arg3: memref<1x128xf32, #tpu.memory_space<vmem>>, %arg4: memref<128x128xf32, #tpu.memory_space<vmem>>, %arg5: memref<128x4xf32, #tpu.memory_space<vmem>>, %arg6: memref<4x128xf32, #tpu.memory_space<vmem>>, %arg7: memref<4x128xf32, #tpu.memory_space<vmem>>) attributes {dimension_semantics = [#tpu.dimension_semantics<parallel>], iteration_bounds = array<i64: 1>, scalar_prefetch = 0 : i64, scratch_operands = 0 : i64, tpu.core_type = #tpu.core_type<tc>, window_params = [{transform_indices = @transform_0, window_bounds = array<i64: 4, 128>}, {pipeline_mode = #tpu.pipeline_mode<synchronous>, transform_indices = @transform_1, window_bounds = array<i64: 1, 128>}, {pipeline_mode = #tpu.pipeline_mode<synchronous>, transform_indices = @transform_2, window_bounds = array<i64: 1, 128>}, {pipeline_mode = #tpu.pipeline_mode<synchronous>, transform_indices = @transform_3, window_bounds = array<i64: 128, 128>}, {pipeline_mode = #tpu.pipeline_mode<synchronous>, transform_indices = @transform_4, window_bounds = array<i64: 128, 4>}, {pipeline_mode = #tpu.pipeline_mode<synchronous>, transform_indices = @transform_5, window_bounds = array<i64: 4, 128>}, {transform_indices = @transform_6, window_bounds = array<i64: 4, 128>}]} {
    %c0 = arith.constant 0 : index
    %c0_0 = arith.constant 0 : index
    %0 = vector.load %arg1[%c0, %c0_0] : memref<4x128xf32, #tpu.memory_space<vmem>>, vector<4x128xf32>
    %c0_1 = arith.constant 0 : index
    %c0_2 = arith.constant 0 : index
    %1 = vector.load %arg4[%c0_1, %c0_2] : memref<128x128xf32, #tpu.memory_space<vmem>>, vector<128x128xf32>
    %cst = arith.constant dense<0.000000e+00> : vector<4x128xf32>
    %2 = tpu.matmul %0, %1, %cst {dimension_numbers = #tpu.dot_dimension_numbers<[1], [0], [0], [1], [0, 0, 1, 1], [], []>, precision = #tpu.contract_precision<fp32>} : vector<4x128xf32>, vector<128x128xf32>, vector<4x128xf32> -> vector<4x128xf32>
    %3 = arith.subf %0, %2 : vector<4x128xf32>
    %4 = arith.mulf %3, %3 : vector<4x128xf32>
    %c0_3 = arith.constant 0 : index
    %c0_4 = arith.constant 0 : index
    %5 = vector.load %arg5[%c0_3, %c0_4] : memref<128x4xf32, #tpu.memory_space<vmem>>, vector<128x4xf32>
    %cst_5 = arith.constant dense<0.000000e+00> : vector<4x4xf32>
    %6 = tpu.matmul %4, %5, %cst_5 {dimension_numbers = #tpu.dot_dimension_numbers<[1], [0], [0], [1], [0, 0, 1, 1], [], []>, precision = #tpu.contract_precision<fp32>} : vector<4x128xf32>, vector<128x4xf32>, vector<4x4xf32> -> vector<4x4xf32>
    %cst_6 = arith.constant 9.99999997E-7 : f32
    %7 = vector.broadcast %cst_6 : f32 to vector<4x4xf32>
    %8 = arith.addf %6, %7 : vector<4x4xf32>
    %9 = math.rsqrt %8 : vector<4x4xf32>
    %c0_7 = arith.constant 0 : index
    %c0_8 = arith.constant 0 : index
    %10 = vector.load %arg6[%c0_7, %c0_8] : memref<4x128xf32, #tpu.memory_space<vmem>>, vector<4x128xf32>
    %cst_9 = arith.constant dense<0.000000e+00> : vector<4x128xf32>
    %11 = tpu.matmul %9, %10, %cst_9 {dimension_numbers = #tpu.dot_dimension_numbers<[1], [0], [0], [1], [0, 0, 1, 1], [], []>, precision = #tpu.contract_precision<fp32>} : vector<4x4xf32>, vector<4x128xf32>, vector<4x128xf32> -> vector<4x128xf32>
    %12 = arith.mulf %3, %11 : vector<4x128xf32>
    %c0_10 = arith.constant 0 : index
    %c0_11 = arith.constant 0 : index
    %13 = vector.load %arg2[%c0_10, %c0_11] : memref<1x128xf32, #tpu.memory_space<vmem>>, vector<1x128xf32>
    %14 = vector.broadcast %13 : vector<1x128xf32> to vector<4x128xf32>
    %15 = arith.mulf %12, %14 : vector<4x128xf32>
    %c0_12 = arith.constant 0 : index
    %c0_13 = arith.constant 0 : index
    %16 = vector.load %arg3[%c0_12, %c0_13] : memref<1x128xf32, #tpu.memory_space<vmem>>, vector<1x128xf32>
    %17 = vector.broadcast %16 : vector<1x128xf32> to vector<4x128xf32>
    %18 = arith.addf %15, %17 : vector<4x128xf32>
    %c0_14 = arith.constant 0 : index
    %c0_15 = arith.constant 0 : index
    %19 = vector.load %arg7[%c0_14, %c0_15] : memref<4x128xf32, #tpu.memory_space<vmem>>, vector<4x128xf32>
    tpu.vector_store %arg7[%c0_14, %c0_15], %18 {strides = array<i32>} : memref<4x128xf32, #tpu.memory_space<vmem>>, vector<4x128xf32>,
    return
  }
  func.func @transform_0(%arg0: i32) -> (i32, i32) {
    %c0_i32 = arith.constant 0 : i32
    %c0_i32_0 = arith.constant 0 : i32
    return %arg0, %c0_i32 : i32, i32
  }
  func.func @transform_1(%arg0: i32) -> (i32, i32) {
    %c0_i32 = arith.constant 0 : i32
    %c0_i32_0 = arith.constant 0 : i32
    %c0_i32_1 = arith.constant 0 : i32
    return %c0_i32, %c0_i32_0 : i32, i32
  }
  func.func @transform_2(%arg0: i32) -> (i32, i32) {
    %c0_i32 = arith.constant 0 : i32
    %c0_i32_0 = arith.constant 0 : i32
    %c0_i32_1 = arith.constant 0 : i32
    return %c0_i32, %c0_i32_0 : i32, i32
  }
  func.func @transform_3(%arg0: i32) -> (i32, i32) {
    %c0_i32 = arith.constant 0 : i32
    %c0_i32_0 = arith.constant 0 : i32
    %c0_i32_1 = arith.constant 0 : i32
    return %c0_i32, %c0_i32_0 : i32, i32
  }
  func.func @transform_4(%arg0: i32) -> (i32, i32) {
    %c0_i32 = arith.constant 0 : i32
    %c0_i32_0 = arith.constant 0 : i32
    %c0_i32_1 = arith.constant 0 : i32
    return %c0_i32, %c0_i32_0 : i32, i32
  }
  func.func @transform_5(%arg0: i32) -> (i32, i32) {
    %c0_i32 = arith.constant 0 : i32
    %c0_i32_0 = arith.constant 0 : i32
    %c0_i32_1 = arith.constant 0 : i32
    return %c0_i32, %c0_i32_0 : i32, i32
  }
  func.func @transform_6(%arg0: i32) -> (i32, i32) {
    %c0_i32 = arith.constant 0 : i32
    %c0_i32_0 = arith.constant 0 : i32
    return %arg0, %c0_i32 : i32, i32
  }
}

</mosaic_0001>

<bundles_post_ra>
// kernel: tpu_custom_call.1
= control target key start
LH: loop header
LB: loop body
LE: loop exit
PB: predicated region body
PF: predicated region fallthrough
CT: control target
= control target key end

     0   :  { %v2845_v3 = vmov 0.0|0.0   ;;  %vm2846_vm0 = vmmov 0   ;;  %v2847_v8 = vmov 0.0   ;;  %s3504_s0 = inlined_call_operand.vmem [shape: f32[4,128], index: 0, kind: input, shape index: {}]   ;;  %s3505_s1 = inlined_call_operand.vmem [shape: f32[1,128], index: 1, kind: input, shape index: {}]   ;;  %s3506_s2 = inlined_call_operand.vmem [shape: f32[1,128], index: 2, kind: input, shape index: {}]   ;;  %s3507_s3 = inlined_call_operand.vmem [shape: f32[128,128], index: 3, kind: input, shape index: {}]   ;;  %s3508_s4 = inlined_call_operand.vmem [shape: f32[128,4], index: 4, kind: input, shape index: {}]   ;;  %s3509_s5 = inlined_call_operand.vmem [shape: f32[4,128], index: 5, kind: input, shape index: {}]   ;;  %s3510_s6 = inlined_call_operand.hbm [shape: f32[4,128], index: 6, kind: output, shape index: {}]  }
   0x1   :  { %v25_v0 = vld [vmem:[%s3507_s3] sm:$0xff]  ;;  %v26_v1 = vld [vmem:[%s3507_s3 + $0x8] sm:$0xff]  ;;  %v27_v2 = vld [vmem:[%s3507_s3 + $0x10] sm:$0xff]  ;;  %2497 = vmatprep.subr.bf16.mxu0 %v2845_v3  ;;  %2079 = vmatprep.mubr.msk.f32.mxu0 %vm2846_vm0, %v2847_v8 }
   0x2   :  { %v42_v4 = vand.u32 4294901760, %v25_v0  ;;  %v45_v5 = vand.u32 4294901760, %v26_v1  ;;  %v28_v6 = vld [vmem:[%s3507_s3 + $0x18] sm:$0xff]  ;;  %v48_v7 = vand.u32 4294901760, %v27_v2  ;;  %v29_v10 = vld [vmem:[%s3507_s3 + $0x20] sm:$0xff]  ;;  %v30_v11 = vld [vmem:[%s3507_s3 + $0x28] sm:$0xff]  ;;  %2641 = vmatprep.subr.bf16.mxu1 %v2845_v3  ;;  %2289 = vmatprep.mubr.msk.f32.mxu1 %vm2846_vm0, %v2847_v8 }
   0x3   :  { %v51_v9 = vand.u32 4294901760, %v28_v6  ;;  %v54_v14 = vand.u32 4294901760, %v29_v10  ;;  %v57_v15 = vand.u32 4294901760, %v30_v11  ;;  %v31_v16 = vld [vmem:[%s3507_s3 + $0x30] sm:$0xff]  ;;  %v32_v17 = vld [vmem:[%s3507_s3 + $0x38] sm:$0xff] }
   0x4   :  { %v2908_v12 = vpack.c.bf16 %v45_v5, %v42_v4 }
   0x5   :  { %v2911_v13 = vpack.c.bf16 %v51_v9, %v48_v7 }
   0x6   :  { %2499 = vmatpush3.bf16.msra.mxu0 %v2908_v12 }
   0x7   :  { %2500 = vmatprep.subr.bf16.mxu0 %v2845_v3 }
   0x8   :  { %11 = vsyncpa [#allocation3], 0  ;;  %v2921_v18 = vpack.c.bf16 %v57_v15, %v54_v14  ;;  %v60_v19 = vand.u32 4294901760, %v31_v16  ;;  %v63_v20 = vand.u32 4294901760, %v32_v17  ;;  %v33_v21 = vld [vmem:[%s3507_s3 + $0x40] sm:$0xff]  ;;  %v34_v22 = vld [vmem:[%s3507_s3 + $0x48] sm:$0xff]  ;;  %v2935_v24 = vsub.f32 %v25_v0, %v42_v4 }
   0x9   :  { %v2933_v23 = vld [vmem:[%s3504_s0] sm:$0xf]  ;;  %v2937_v25 = vsub.f32 %v26_v1, %v45_v5  ;;  %v66_v27 = vand.u32 4294901760, %v33_v21  ;;  %v69_v28 = vand.u32 4294901760, %v34_v22  ;;  %v35_v29 = vld [vmem:[%s3507_s3 + $0x50] sm:$0xff]  ;;  %v36_v30 = vld [vmem:[%s3507_s3 + $0x58] sm:$0xff]  ;;  %v2955_v33 = vsub.f32 %v27_v2, %v48_v7 }
   0xa   :  { %2502 = vmatpush3.bf16.msra.mxu0 %v2911_v13  ;;  %v2940_v26 = vpack.c.bf16 %v63_v20, %v60_v19  ;;  %v2950_v31 = vand.u32 4294901760, %v2933_v23  ;;  %v37_v32 = vld [vmem:[%s3507_s3 + $0x60] sm:$0xff]  ;;  %v72_v34 = vand.u32 4294901760, %v35_v29  ;;  %v38_v35 = vld [vmem:[%s3507_s3 + $0x68] sm:$0xff]  ;;  %v39_v36 = vld [vmem:[%s3507_s3 + $0x70] sm:$0xff]  ;;  %v75_v39 = vand.u32 4294901760, %v36_v30 }
   0xb   :  { %2503 = vmatprep.subr.bf16.mxu0 %v2845_v3  ;;  %v40_v37 = vld [vmem:[%s3507_s3 + $0x78] sm:$0xff]  ;;  %v2967_v38 = vpack.c.bf16 %v69_v28, %v66_v27  ;;  %v135_v40 = vand.u32 4294901760, %v2935_v24  ;;  %v142_v41 = vand.u32 4294901760, %v2937_v25  ;;  %v2971_v42 = vsub.f32 %v28_v6, %v51_v9  ;;  %s2848_s15 = smov [#allocation2]  }
   0xc   :  { %v2973_v43 = vsub.f32 %v29_v10, %v54_v14  ;;  %v2975_v44 = vsub.f32 %v30_v11, %v57_v15  ;;  %v2980_v45 = vsub.f32 %v2933_v23, %v2950_v31  ;;  %v78_v46 = vand.u32 4294901760, %v37_v32  ;;  %s1821_s16 = sshll.u32 %s2848_s15, 4  ;;  %s1822_s16 = int_to_ptr.vmem [resolvable:$true] %s1821_s16 }
   0xd   :  { %v81_v47 = vand.u32 4294901760, %v38_v35  ;;  %v84_v48 = vand.u32 4294901760, %v39_v36  ;;  %v87_v49 = vand.u32 4294901760, %v40_v37  ;;  %v2982_v50 = vsub.f32 %v31_v16, %v60_v19  ;;  %s2821_s17 = scalar_lea.vmem %s1822_s16, 64  ;;  %p2826_p1 = scmp.lt.s32.totalorder %s1822_s16, %s1822_s16 }
   0xe   :  { %2505 = vmatpush3.bf16.msra.mxu0 %v2921_v18  ;;  %v2984_v51 = vsub.f32 %v32_v17, %v63_v20  ;;  %v2986_v52 = vsub.f32 %v33_v21, %v66_v27  ;;  %v149_v53 = vand.u32 4294901760, %v2955_v33  ;;  %v2990_v54 = vsub.f32 %v34_v22, %v69_v28  ;;  %p2822_p0 = scmp.ne.s32.totalorder %s1822_s16, %s2821_s17  ;;  %p2827_p2 = scmp.lt.s32.totalorder %s2821_s17, %s2821_s17 }
   0xf   :  { %2506 = vmatprep.subr.bf16.mxu0 %v2845_v3  ;;  %v2992_v55 = vpack.c.bf16 %v75_v39, %v72_v34  ;;  %v136_v56 = vsub.f32 %v2935_v24, %v135_v40  ;;  %v143_v57 = vsub.f32 %v2937_v25, %v142_v41  ;;  %v2997_v58 = vsub.f32 %v35_v29, %v72_v34 }
  0x10   :  { %v2999_v59 = vsub.f32 %v36_v30, %v75_v39  ;;  %v3001_v60 = vsub.f32 %v37_v32, %v78_v46  ;;  %v3511_v61 = vand.u32 4294901760, %v2980_v45  ;;  %v3004_v62 = vpack.c.bf16 %v81_v47, %v78_v46  ;;  %p2828_p3 = por %p2827_p2, %p2826_p1 }
  0x11   :  { %v3006_v63 = vsub.f32 %v38_v35, %v81_v47  ;;  %v3008_v0 = vpack.c.bf16 %v87_v49, %v84_v48  ;;  %v3010_v1 = vsub.f32 %v39_v36, %v84_v48  ;;  %v3012_v2 = vsub.f32 %v40_v37, %v87_v49 }
  0x12   :  { %2508 = vmatpush3.bf16.msra.mxu0 %v2940_v26  ;;  %v150_v4 = vsub.f32 %v2955_v33, %v149_v53  ;;  %v156_v5 = vand.u32 4294901760, %v2971_v42  ;;  %v163_v6 = vand.u32 4294901760, %v2973_v43  ;;  %v137_v7 = vand.u32 4294901760, %v136_v56  ;;  %p2829_p4 = pnand %p2828_p3, %p2822_p0 }
  0x13   :  { %2509 = vmatprep.subr.bf16.mxu0 %v2845_v3  ;;  %v144_v9 = vand.u32 4294901760, %v143_v57  ;;  %v170_v10 = vand.u32 4294901760, %v2975_v44  ;;  %v177_v11 = vand.u32 4294901760, %v2982_v50  ;;  %v125_v14 = vsub.f32 %v2980_v45, %v3511_v61 }
  0x14   :  { %v184_v15 = vand.u32 4294901760, %v2984_v51  ;;  %v191_v16 = vand.u32 4294901760, %v2986_v52  ;;  %v198_v17 = vand.u32 4294901760, %v2990_v54  ;;  %v205_v19 = vand.u32 4294901760, %v2997_v58 }
  0x15   :  { %v212_v20 = vand.u32 4294901760, %v2999_v59  ;;  %v219_v21 = vand.u32 4294901760, %v3001_v60  ;;  %v226_v22 = vand.u32 4294901760, %v3006_v63  ;;  %v233_v27 = vand.u32 4294901760, %v3010_v1 }
  0x16   :  { %2511 = vmatpush3.bf16.msra.mxu0 %v2967_v38  ;;  %v240_v28 = vand.u32 4294901760, %v3012_v2  ;;  %v3033_v29 = vpack.c.bf16 %v142_v41, %v135_v40  ;;  %v3035_v30 = vpack.c.bf16 %v156_v5, %v149_v53  ;;  %v157_v32 = vsub.f32 %v2971_v42, %v156_v5 }
  0x17   :  { %2512 = vmatprep.subr.bf16.mxu0 %v2845_v3  ;;  %v3039_v34 = vpack.c.bf16 %v170_v10, %v163_v6  ;;  %v3041_v35 = vpack.c.bf16 %v184_v15, %v177_v11  ;;  %v3043_v36 = vpack.c.bf16 %v198_v17, %v191_v16  ;;  %v3046_v37 = vpack.c.bf16 %v212_v20, %v205_v19 }
  0x18   :  { %v3048_v39 = vpack.c.bf16 %v226_v22, %v219_v21  ;;  %v3050_v40 = vpack.c.bf16 %v240_v28, %v233_v27  ;;  %v126_v41 = vand.u32 4294901760, %v125_v14  ;;  %v151_v46 = vand.u32 4294901760, %v150_v4 }
  0x19   :  { %v2522_v47 = vpack.c.bf16 %v144_v9, %v137_v7  ;;  %v158_v48 = vand.u32 4294901760, %v157_v32  ;;  %v164_v49 = vsub.f32 %v2973_v43, %v163_v6  ;;  %v171_v53 = vsub.f32 %v2975_v44, %v170_v10 }
  0x1a   :  { %2514 = vmatpush3.bf16.msra.mxu0 %v2992_v55  ;;  %v178_v56 = vsub.f32 %v2982_v50, %v177_v11  ;;  %v185_v14 = vsub.f32 %v2984_v51, %v184_v15  ;;  %v192_v4 = vsub.f32 %v2986_v52, %v191_v16  ;;  %v199_v10 = vsub.f32 %v2990_v54, %v198_v17 }
  0x1b   :  { %2515 = vmatprep.subr.bf16.mxu0 %v2845_v3  ;;  %v2525_v57 = vpack.c.bf16 %v158_v48, %v151_v46  ;;  %v165_v5 = vand.u32 4294901760, %v164_v49  ;;  %v172_v61 = vand.u32 4294901760, %v171_v53  ;;  %v206_v15 = vsub.f32 %v2997_v58, %v205_v19 }
  0x1c   :  { %v179_v7 = vand.u32 4294901760, %v178_v56  ;;  %v186_v9 = vand.u32 4294901760, %v185_v14  ;;  %v193_v11 = vand.u32 4294901760, %v192_v4  ;;  %v213_v46 = vsub.f32 %v2999_v59, %v212_v20  ;;  %v686_v4 = vld [vmem:[%s3508_s4 + $0x10] sm:$0xff] }
  0x1d   :  { %v2528_v6 = vpack.c.bf16 %v172_v61, %v165_v5  ;;  %v220_v16 = vsub.f32 %v3001_v60, %v219_v21  ;;  %v227_v17 = vsub.f32 %v3006_v63, %v226_v22  ;;  %v234_v19 = vsub.f32 %v3010_v1, %v233_v27  ;;  %v684_v27 = vld [vmem:[%s3508_s4] sm:$0xff] }
  0x1e   :  { %2517 = vmatpush3.bf16.msra.mxu0 %v3004_v62  ;;  %v2531_v32 = vpack.c.bf16 %v186_v9, %v179_v7  ;;  %v214_v48 = vand.u32 4294901760, %v213_v46  ;;  %v241_v20 = vsub.f32 %v3012_v2, %v240_v28  ;;  %v2546_v14 = vpack.c.bf16 %v2937_v25, %v2935_v24  ;;  %v685_v28 = vld [vmem:[%s3508_s4 + $0x8] sm:$0xff]  ;;  %v687_v7 = vld [vmem:[%s3508_s4 + $0x18] sm:$0xff]  ;;  %v692_v46 = vld [vmem:[%s3508_s4 + $0x40] sm:$0xff] }
  0x1f   :  { %2518 = vmatprep.subr.bf16.mxu0 %v2845_v3  ;;  %v221_v49 = vand.u32 4294901760, %v220_v16  ;;  %v228_v56 = vand.u32 4294901760, %v227_v17  ;;  %v2549_v24 = vpack.c.bf16 %v2971_v42, %v2955_v33  ;;  %v701_v25 = vand.u32 4294901760, %v684_v27  ;;  %v693_v17 = vld [vmem:[%s3508_s4 + $0x48] sm:$0xff] }
  0x20   :  { %v242_v5 = vand.u32 4294901760, %v241_v20  ;;  %v707_v9 = vand.u32 4294901760, %v686_v4  ;;  %v710_v33 = vand.u32 4294901760, %v687_v7  ;;  %vm1347_vm1 = vcmask 1043456  }
  0x21   :  { %v2540_v21 = vpack.c.bf16 %v228_v56, %v221_v49  ;;  %v2552_v49 = vpack.c.bf16 %v2975_v44, %v2973_v43  ;;  %vm1343_vm2 = vcmask 31744  }
  0x22   :  { %2520 = vmatpush3.bf16.msra.mxu0 %v3008_v0  ;;  %v3126_v56 = vsub.f32 %v687_v7, %v710_v33 }
  0x23   :  { %2521 = vmatprep.subr.bf16.mxu0 %v2845_v3 }
  0x25   :  { %2080 = vmatmul.mubr.f32.vlgmr.msra.gmra.mrb[0].mxu0 %v126_v41  ;;  %v200_v41 = vand.u32 4294901760, %v199_v10  ;;  %v688_v10 = vld [vmem:[%s3508_s4 + $0x20] sm:$0xff] }
  0x26   :  { %2523 = vmatpush3.bf16.msra.mxu0 %v2522_v47  ;;  %2114 = vmatprep.mubr.msk.f32.mxu0 %vm2846_vm0, %v2847_v8  ;;  %v207_v47 = vand.u32 4294901760, %v206_v15  ;;  %v713_v42 = vand.u32 4294901760, %v688_v10  ;;  %v691_v15 = vld [vmem:[%s3508_s4 + $0x38] sm:$0xff] }
  0x27   :  { %2524 = vmatprep.subr.bf16.mxu0 %v2845_v3  ;;  %v2534_v61 = vpack.c.bf16 %v200_v41, %v193_v11  ;;  %v689_v11 = vld [vmem:[%s3508_s4 + $0x28] sm:$0xff]  ;;  %v690_v41 = vld [vmem:[%s3508_s4 + $0x30] sm:$0xff] }
  0x28   :  { %v2537_v53 = vpack.c.bf16 %v214_v48, %v207_v47  ;;  %v3117_v48 = vsub.f32 %v686_v4, %v707_v9 }
  0x2a   :  { %2526 = vmatpush3.bf16.msra.mxu0 %v2525_v57  ;;  %v235_v57 = vand.u32 4294901760, %v234_v19  ;;  %v3128_v19 = vsub.f32 %v688_v10, %v713_v42  ;;  %v808_v10 = vand.u32 4294901760, %v3117_v48 }
  0x2b   :  { %2527 = vmatprep.subr.bf16.mxu0 %v2845_v3 }
  0x2c   :  { %v2543_v22 = vpack.c.bf16 %v242_v5, %v235_v57  ;;  %v722_v57 = vand.u32 4294901760, %v691_v15  ;;  %v725_v5 = vand.u32 4294901760, %v692_v46 }
  0x2e   :  { %2529 = vmatpush3.bf16.msra.mxu0 %v2528_v6  ;;  %v704_v6 = vand.u32 4294901760, %v685_v28  ;;  %v3137_v44 = vsub.f32 %v691_v15, %v722_v57 }
  0x2f   :  { %2530 = vmatprep.subr.bf16.mxu0 %v2845_v3 }
  0x30   :  { %v3111_v16 = vpack.c.bf16 %v704_v6, %v701_v25  ;;  %v3115_v47 = vsub.f32 %v685_v28, %v704_v6  ;;  %v2555_v28 = vpack.c.bf16 %v2984_v51, %v2982_v50  ;;  %v2561_v50 = vpack.c.bf16 %v2999_v59, %v2997_v58 }
  0x31   :  { %v3516_v58 = vand.u32 4294901760, %v2980_v45 }
  0x32   :  { %2532 = vmatpush3.bf16.msra.mxu0 %v2531_v32  ;;  %v716_v32 = vand.u32 4294901760, %v689_v11  ;;  %2643 = vmatpush3.bf16.msra.mxu1 %v3111_v16 }
  0x33   :  { %2533 = vmatprep.subr.bf16.mxu0 %v2845_v3  ;;  %2644 = vmatprep.subr.bf16.mxu1 %v2845_v3 }
  0x34   :  { %v3131_v20 = vsub.f32 %v689_v11, %v716_v32  ;;  %v3146_v4 = vpack.c.bf16 %v716_v32, %v713_v42  ;;  %v815_v11 = vand.u32 4294901760, %v3126_v56  ;;  %v809_v42 = vsub.f32 %v3117_v48, %v808_v10 }
  0x36   :  { %2535 = vmatpush3.bf16.msra.mxu0 %v2534_v61  ;;  %v3113_v61 = vsub.f32 %v684_v27, %v701_v25  ;;  %v816_v32 = vsub.f32 %v3126_v56, %v815_v11  ;;  %v810_v15 = vand.u32 4294901760, %v809_v42 }
  0x37   :  { %2536 = vmatprep.subr.bf16.mxu0 %v2845_v3 }
  0x3a   :  { %2538 = vmatpush3.bf16.msra.mxu0 %v2537_v53  ;;  %v3124_v53 = vpack.c.bf16 %v710_v33, %v707_v9 }
  0x3b   :  { %2539 = vmatprep.subr.bf16.mxu0 %v2845_v3 }
  0x3c   :  { %2646 = vmatpush3.bf16.msra.mxu1 %v3124_v53 }
  0x3d   :  { %2647 = vmatprep.subr.bf16.mxu1 %v2845_v3 }
  0x3e   :  { %2541 = vmatpush3.bf16.msra.mxu0 %v2540_v21  ;;  %v719_v21 = vand.u32 4294901760, %v690_v41 }
  0x3f   :  { %2542 = vmatprep.subr.bf16.mxu0 %v2845_v3 }
  0x40   :  { %v3135_v43 = vsub.f32 %v690_v41, %v719_v21  ;;  %2649 = vmatpush3.bf16.msra.mxu1 %v3146_v4  ;;  %v3153_v25 = vpack.c.bf16 %v722_v57, %v719_v21 }
  0x41   :  { %2650 = vmatprep.subr.bf16.mxu1 %v2845_v3 }
  0x42   :  { %2544 = vmatpush3.bf16.msra.mxu0 %v2543_v22  ;;  %v728_v22 = vand.u32 4294901760, %v693_v17 }
  0x43   :  { %2545 = vmatprep.subr.bf16.mxu0 %v2845_v3 }
  0x44   :  { %v3141_v27 = vsub.f32 %v693_v17, %v728_v22  ;;  %2652 = vmatpush3.bf16.msra.mxu1 %v3153_v25  ;;  %v3160_v51 = vpack.c.bf16 %v728_v22, %v725_v5  ;;  %v822_v17 = vand.u32 4294901760, %v3128_v19 }
  0x45   :  { %2115 = vmatmul.mubr.f32.vlgmr.msra.gmra.mrb[0].mxu0 %v2950_v31  ;;  %2653 = vmatprep.subr.bf16.mxu1 %v2845_v3 }
  0x46   :  { %2547 = vmatpush3.bf16.msra.mxu0 %v2546_v14  ;;  %2149 = vmatprep.mubr.msk.f32.mxu0 %vm2846_vm0, %v2847_v8  ;;  %v3139_v14 = vsub.f32 %v692_v46, %v725_v5  ;;  %v817_v46 = vand.u32 4294901760, %v816_v32  ;;  %v823_v57 = vsub.f32 %v3128_v19, %v822_v17 }
  0x47   :  { %2548 = vmatprep.subr.bf16.mxu0 %v2845_v3 }
  0x48   :  { %2655 = vmatpush3.bf16.msra.mxu1 %v3160_v51  ;;  %v2669_v21 = vpack.c.bf16 %v817_v46, %v810_v15  ;;  %v824_v22 = vand.u32 4294901760, %v823_v57 }
  0x49   :  { %2656 = vmatprep.subr.bf16.mxu1 %v2845_v3 }
  0x4a   :  { %2550 = vmatpush3.bf16.msra.mxu0 %v2549_v24  ;;  %v2558_v24 = vpack.c.bf16 %v2990_v54, %v2986_v52  ;;  %v2564_v52 = vpack.c.bf16 %v3006_v63, %v3001_v60  ;;  %v2567_v54 = vpack.c.bf16 %v3012_v2, %v3010_v1  ;;  %v699_v63 = vld [vmem:[%s3508_s4 + $0x78] sm:$0xff] }
  0x4b   :  { %2551 = vmatprep.subr.bf16.mxu0 %v2845_v3 }
  0x4e   :  { %2553 = vmatpush3.bf16.msra.mxu0 %v2552_v49  ;;  %v829_v49 = vand.u32 4294901760, %v3131_v20 }
  0x4f   :  { %2554 = vmatprep.subr.bf16.mxu0 %v2845_v3 }
  0x50   :  { %v830_v5 = vsub.f32 %v3131_v20, %v829_v49 }
  0x52   :  { %2556 = vmatpush3.bf16.msra.mxu0 %v2555_v28  ;;  %v831_v28 = vand.u32 4294901760, %v830_v5 }
  0x53   :  { %2557 = vmatprep.subr.bf16.mxu0 %v2845_v3 }
  0x56   :  { %2559 = vmatpush3.bf16.msra.mxu0 %v2558_v24  ;;  %v836_v24 = vand.u32 4294901760, %v3135_v43 }
  0x57   :  { %2560 = vmatprep.subr.bf16.mxu0 %v2845_v3 }
  0x5a   :  { %2562 = vmatpush3.bf16.msra.mxu0 %v2561_v50  ;;  %v843_v50 = vand.u32 4294901760, %v3137_v44 }
  0x5b   :  { %2563 = vmatprep.subr.bf16.mxu0 %v2845_v3 }
  0x5e   :  { %2565 = vmatpush3.bf16.msra.mxu0 %v2564_v52  ;;  %v2672_v52 = vpack.c.bf16 %v831_v28, %v824_v22 }
  0x5f   :  { %2566 = vmatprep.subr.bf16.mxu0 %v2845_v3 }
  0x62   :  { %2568 = vmatpush3.bf16.msra.mxu0 %v2567_v54  ;;  %v837_v54 = vsub.f32 %v3135_v43, %v836_v24 }
  0x63   :  { %2569 = vmatprep.subr.bf16.mxu0 %v2845_v3 }
  0x65   :  { %2150 = vmatmul.mubr.f32.vlgmr.msra.gmra.mrb[0].mxu0 %v2980_v45  ;;  %v696_v45 = vld [vmem:[%s3508_s4 + $0x60] sm:$0xff] }
  0x66   :  { %2571 = vmatpush3.bf16.msra.mxu0 %v2908_v12  ;;  %2184 = vmatprep.mubr.msk.f32.mxu0 %vm2846_vm0, %v2847_v8 }
  0x67   :  { %2572 = vmatprep.subr.bf16.mxu0 %v2845_v3 }
  0x6a   :  { %2574 = vmatpush3.bf16.msra.mxu0 %v2911_v13 }
  0x6b   :  { %2575 = vmatprep.subr.bf16.mxu0 %v2845_v3 }
  0x6e   :  { %2577 = vmatpush3.bf16.msra.mxu0 %v2921_v18 }
  0x6f   :  { %2578 = vmatprep.subr.bf16.mxu0 %v2845_v3 }
  0x72   :  { %2580 = vmatpush3.bf16.msra.mxu0 %v2940_v26 }
  0x73   :  { %2581 = vmatprep.subr.bf16.mxu0 %v2845_v3 }
  0x76   :  { %2583 = vmatpush3.bf16.msra.mxu0 %v2967_v38 }
  0x77   :  { %2584 = vmatprep.subr.bf16.mxu0 %v2845_v3 }
  0x7a   :  { %2586 = vmatpush3.bf16.msra.mxu0 %v2992_v55 }
  0x7b   :  { %2587 = vmatprep.subr.bf16.mxu0 %v2845_v3 }
  0x7e   :  { %2589 = vmatpush3.bf16.msra.mxu0 %v3004_v62 }
  0x7f   :  { %2590 = vmatprep.subr.bf16.mxu0 %v2845_v3 }
  0x82   :  { %2592 = vmatpush3.bf16.msra.mxu0 %v3008_v0 }
  0x83   :  { %2593 = vmatprep.subr.bf16.mxu0 %v2845_v3 }
  0x85   :  { %2185 = vmatmul.mubr.f32.vlgmr.msra.gmra.mrb[0].mxu0 %v3516_v58  ;;  %v844_v58 = vsub.f32 %v3137_v44, %v843_v50 }
  0x86   :  { %2595 = vmatpush3.bf16.msra.mxu0 %v3033_v29  ;;  %2219 = vmatprep.mubr.msk.f32.mxu0 %vm2846_vm0, %v2847_v8 }
  0x87   :  { %2596 = vmatprep.subr.bf16.mxu0 %v2845_v3 }
  0x8a   :  { %2598 = vmatpush3.bf16.msra.mxu0 %v3035_v30 }
  0x8b   :  { %2599 = vmatprep.subr.bf16.mxu0 %v2845_v3 }
  0x8e   :  { %2601 = vmatpush3.bf16.msra.mxu0 %v3039_v34  ;;  %v746_v34 = vand.u32 4294901760, %v699_v63 }
  0x8f   :  { %2602 = vmatprep.subr.bf16.mxu0 %v2845_v3 }
  0x92   :  { %2604 = vmatpush3.bf16.msra.mxu0 %v3041_v35  ;;  %v794_v35 = vand.u32 4294901760, %v3113_v61 }
  0x93   :  { %2605 = vmatprep.subr.bf16.mxu0 %v2845_v3 }
  0x94   :  { %v795_v6 = vsub.f32 %v3113_v61, %v794_v35 }
  0x96   :  { %2607 = vmatpush3.bf16.msra.mxu0 %v3043_v36  ;;  %v801_v36 = vand.u32 4294901760, %v3115_v47  ;;  %v796_v9 = vand.u32 4294901760, %v795_v6 }
  0x97   :  { %2608 = vmatprep.subr.bf16.mxu0 %v2845_v3 }
  0x98   :  { %v802_v7 = vsub.f32 %v3115_v47, %v801_v36 }
  0x9a   :  { %2610 = vmatpush3.bf16.msra.mxu0 %v3046_v37  ;;  %v803_v33 = vand.u32 4294901760, %v802_v7 }
  0x9b   :  { %2611 = vmatprep.subr.bf16.mxu0 %v2845_v3 }
  0x9c   :  { %v3292_v41 = vpack.c.bf16 %v803_v33, %v796_v9 }
  0x9e   :  { %2613 = vmatpush3.bf16.msra.mxu0 %v3048_v39 }
  0x9f   :  { %2614 = vmatprep.subr.bf16.mxu0 %v2845_v3 }
  0xa2   :  { %2616 = vmatpush3.bf16.msra.mxu0 %v3050_v40  ;;  %v3274_v40 = vsub.f32 %v699_v63, %v746_v34 }
  0xa3   :  { %2617 = vmatprep.subr.bf16.mxu0 %v2845_v3 }
  0xa5   :  { %2220 = vmatmul.mubr.f32.vlgmr.msra.gmra.mrb[0].mxu0 %v2950_v31 }
  0xa6   :  { %2619 = vmatpush3.bf16.msra.mxu0 %v2908_v12  ;;  %2254 = vmatprep.mubr.msk.f32.mxu0 %vm2846_vm0, %v2847_v8  ;;  %v694_v12 = vld [vmem:[%s3508_s4 + $0x50] sm:$0xff] }
  0xa7   :  { %2620 = vmatprep.subr.bf16.mxu0 %v2845_v3 }
  0xaa   :  { %2622 = vmatpush3.bf16.msra.mxu0 %v2911_v13  ;;  %v695_v13 = vld [vmem:[%s3508_s4 + $0x58] sm:$0xff] }
  0xab   :  { %2623 = vmatprep.subr.bf16.mxu0 %v2845_v3 }
  0xae   :  { %2625 = vmatpush3.bf16.msra.mxu0 %v2921_v18  ;;  %v731_v18 = vand.u32 4294901760, %v694_v12 }
  0xaf   :  { %2626 = vmatprep.subr.bf16.mxu0 %v2845_v3 }
  0xb2   :  { %2628 = vmatpush3.bf16.msra.mxu0 %v2940_v26  ;;  %v734_v26 = vand.u32 4294901760, %v695_v13 }
  0xb3   :  { %2629 = vmatprep.subr.bf16.mxu0 %v2845_v3 }
  0xb4   :  { %v3260_v1 = vsub.f32 %v695_v13, %v734_v26  ;;  %v845_v13 = vand.u32 4294901760, %v844_v58 }
  0xb6   :  { %2631 = vmatpush3.bf16.msra.mxu0 %v2967_v38  ;;  %v3240_v38 = vpack.c.bf16 %v734_v26, %v731_v18  ;;  %v857_v26 = vand.u32 4294901760, %v3141_v27 }
  0xb7   :  { %2632 = vmatprep.subr.bf16.mxu0 %v2845_v3 }
  0xb8   :  { %2658 = vmatpush3.bf16.msra.mxu1 %v3240_v38 }
  0xb9   :  { %2659 = vmatprep.subr.bf16.mxu1 %v2845_v3 }
  0xba   :  { %2634 = vmatpush3.bf16.msra.mxu0 %v2992_v55  ;;  %v737_v55 = vand.u32 4294901760, %v696_v45 }
  0xbb   :  { %2635 = vmatprep.subr.bf16.mxu0 %v2845_v3 }
  0xbc   :  { %v3263_v2 = vsub.f32 %v696_v45, %v737_v55 }
  0xbe   :  { %2637 = vmatpush3.bf16.msra.mxu0 %v3004_v62  ;;  %v698_v62 = vld [vmem:[%s3508_s4 + $0x70] sm:$0xff]  ;;  %v3515_v42 = vand.u32 4294901760, %v3263_v2 }
  0xbf   :  { %2638 = vmatprep.subr.bf16.mxu0 %v2845_v3  ;;  %v743_v30 = vand.u32 4294901760, %v698_v62 }
  0xc0   :  { %v879_v46 = vsub.f32 %v3263_v2, %v3515_v42 }
  0xc1   :  { %v3270_v37 = vpack.c.bf16 %v746_v34, %v743_v30  ;;  %v3272_v39 = vsub.f32 %v698_v62, %v743_v30  ;;  %v871_v30 = vand.u32 4294901760, %v3260_v1 }
  0xc2   :  { %2640 = vmatpush3.bf16.msra.mxu0 %v3008_v0  ;;  %v3258_v0 = vsub.f32 %v694_v12, %v731_v18  ;;  %v838_v12 = vand.u32 4294901760, %v837_v54  ;;  %v850_v18 = vand.u32 4294901760, %v3139_v14  ;;  %v880_v5 = vand.u32 4294901760, %v879_v46 }
  0xc3   :  { %2482 = vmatprep.subr.mxu0 %v2847_v8  ;;  %v872_v7 = vsub.f32 %v3260_v1, %v871_v30  ;;  %v3513_v28 = vand.u32 4294901760, %v3272_v39  ;;  %v3512_v54 = vand.u32 4294901760, %v3274_v40 }
  0xc4   :  { %v2675_v45 = vpack.c.bf16 %v845_v13, %v838_v12  ;;  %v864_v63 = vand.u32 4294901760, %v3258_v0  ;;  %v2705_v46 = vpack.c.bf16 %v3260_v1, %v3258_v0 }
  0xc5   :  { %2255 = vmatmul.mubr.f32.vlgmr.msra.gmra.mrb[0].mxu0 %v2950_v31  ;;  %v697_v31 = vld [vmem:[%s3508_s4 + $0x68] sm:$0xff]  ;;  %v873_v33 = vand.u32 4294901760, %v872_v7  ;;  %v893_v12 = vsub.f32 %v3272_v39, %v3513_v28  ;;  %v900_v13 = vsub.f32 %v3274_v40, %v3512_v54  ;;  %v2696_v7 = vpack.c.bf16 %v3131_v20, %v3128_v19 }
  0xc6   :  { %2484 = vmatprep.mubr.msk.f32.mxu0 %vm2846_vm0, %v2847_v8  ;;  %v740_v59 = vand.u32 4294901760, %v697_v31  ;;  %v865_v6 = vsub.f32 %v3258_v0, %v864_v63  ;;  %v3517_v19 = vand.u32 4294901760, %v3263_v2 }
  0xc8   :  { %v3250_v60 = vpack.c.bf16 %v740_v59, %v737_v55  ;;  %v3265_v29 = vsub.f32 %v697_v31, %v740_v59  ;;  %v851_v31 = vsub.f32 %v3139_v14, %v850_v18  ;;  %v858_v55 = vsub.f32 %v3141_v27, %v857_v26 }
  0xc9   :  { %v866_v9 = vand.u32 4294901760, %v865_v6  ;;  %v2693_v6 = vpack.c.bf16 %v3126_v56, %v3117_v48  ;;  %v2750_v48 = vpack.c.bf16 %v857_v26, %v850_v18  ;;  %v2753_v56 = vpack.c.bf16 %v871_v30, %v864_v63 }
  0xca   :  { %2661 = vmatpush3.bf16.msra.mxu1 %v3250_v60  ;;  %v852_v59 = vand.u32 4294901760, %v851_v31  ;;  %v859_v62 = vand.u32 4294901760, %v858_v55  ;;  %v3514_v32 = vand.u32 4294901760, %v3265_v29  ;;  %v894_v31 = vand.u32 4294901760, %v893_v12 }
  0xcb   :  { %2662 = vmatprep.subr.bf16.mxu1 %v2845_v3  ;;  %v2681_v15 = vpack.c.bf16 %v873_v33, %v866_v9  ;;  %v901_v55 = vand.u32 4294901760, %v900_v13  ;;  %v2699_v9 = vpack.c.bf16 %v3137_v44, %v3135_v43  ;;  %v2702_v33 = vpack.c.bf16 %v3141_v27, %v3139_v14 }
  0xcc   :  { %v2678_v34 = vpack.c.bf16 %v859_v62, %v852_v59  ;;  %v886_v57 = vsub.f32 %v3265_v29, %v3514_v32  ;;  %v2690_v62 = vpack.c.bf16 %v3115_v47, %v3113_v61  ;;  %v2744_v61 = vpack.c.bf16 %v829_v49, %v822_v17 }
  0xcd   :  { %v2687_v59 = vpack.c.bf16 %v901_v55, %v894_v31  ;;  %v2747_v47 = vpack.c.bf16 %v843_v50, %v836_v24  ;;  %v3518_v20 = vand.u32 4294901760, %v3265_v29  ;;  %v3519_v44 = vand.u32 4294901760, %v3272_v39  ;;  %v1829_v24 = vld [vmem:[%s3505_s1] ss:$0 sm:$0xff] }
  0xce   :  { %2664 = vmatpush3.bf16.msra.mxu1 %v3270_v37  ;;  %v887_v22 = vand.u32 4294901760, %v886_v57  ;;  %v2708_v57 = vpack.c.bf16 %v3265_v29, %v3263_v2  ;;  %v3520_v14 = vand.u32 4294901760, %v3274_v40 }
  0xcf   :  { %2665 = vmatprep.subr.bf16.mxu1 %v2845_v3  ;;  %v2756_v43 = vpack.c.bf16 %v3518_v20, %v3517_v19 }
  0xd0   :  { %v2684_v58 = vpack.c.bf16 %v887_v22, %v880_v5  ;;  %v2711_v5 = vpack.c.bf16 %v3274_v40, %v3272_v39  ;;  %v2759_v27 = vpack.c.bf16 %v3520_v14, %v3519_v44 }
 0x198   :  { %v678_v22 = vpop.f32.mrb[0].mxu0 }
 0x199   :  { %v3359_v12 = vsub.f32 %v2933_v23, %v678_v22  ;;  %v2256_v13 = vpop.f32.mrb[1].mxu0  ;;  %v2738_v23 = vpack.c.bf16 %v801_v36, %v794_v35 }
 0x19b   :  { %v683_v31 = vmul.f32 %v3359_v12, %v3359_v12 }
 0x19d   :  { %v3363_v55 = vand.u32 4294901760, %v683_v31 }
 0x19f   :  { %v782_v54 = vsub.f32 %v683_v31, %v3363_v55 }
 0x1a1   :  { %v783_v28 = vand.u32 4294901760, %v782_v54 }
 0x1a3   :  { %v784_v32 = vsub.f32 %v782_v54, %v783_v28 }
 0x1a5   :  { %v785_v42 = vand.u32 4294901760, %v784_v32 }
 0x1a7   :  { %2290 = vmatmul.mubr.f32.vlgmr.msra.gmra.mrb[0].mxu1 %v785_v42 }
 0x1a8   :  { %2667 = vmatpush3.bf16.msra.mxu1 %v3292_v41  ;;  %2324 = vmatprep.mubr.msk.f32.mxu1 %vm2846_vm0, %v2847_v8  ;;  %v2741_v41 = vpack.c.bf16 %v815_v11, %v808_v10 }
 0x1a9   :  { %2668 = vmatprep.subr.bf16.mxu1 %v2845_v3 }
 0x1ac   :  { %2670 = vmatpush3.bf16.msra.mxu1 %v2669_v21 }
 0x1ad   :  { %2671 = vmatprep.subr.bf16.mxu1 %v2845_v3 }
 0x1b0   :  { %2673 = vmatpush3.bf16.msra.mxu1 %v2672_v52  ;;  %v1830_v52 = vld [vmem:[%s3506_s2] ss:$0 sm:$0xff] }
 0x1b1   :  { %2674 = vmatprep.subr.bf16.mxu1 %v2845_v3 }
 0x1b4   :  { %2676 = vmatpush3.bf16.msra.mxu1 %v2675_v45 }
 0x1b5   :  { %2677 = vmatprep.subr.bf16.mxu1 %v2845_v3 }
 0x1b8   :  { %2679 = vmatpush3.bf16.msra.mxu1 %v2678_v34 }
 0x1b9   :  { %2680 = vmatprep.subr.bf16.mxu1 %v2845_v3 }
 0x1bc   :  { %2682 = vmatpush3.bf16.msra.mxu1 %v2681_v15 }
 0x1bd   :  { %2683 = vmatprep.subr.bf16.mxu1 %v2845_v3 }
 0x1c0   :  { %2685 = vmatpush3.bf16.msra.mxu1 %v2684_v58 }
 0x1c1   :  { %2686 = vmatprep.subr.bf16.mxu1 %v2845_v3 }
 0x1c4   :  { %2688 = vmatpush3.bf16.msra.mxu1 %v2687_v59 }
 0x1c5   :  { %2689 = vmatprep.subr.bf16.mxu1 %v2845_v3 }
 0x1c7   :  { %2325 = vmatmul.mubr.f32.vlgmr.msra.gmra.mrb[0].mxu1 %v3363_v55 }
 0x1c8   :  { %2691 = vmatpush3.bf16.msra.mxu1 %v2690_v62  ;;  %2359 = vmatprep.mubr.msk.f32.mxu1 %vm2846_vm0, %v2847_v8 }
 0x1c9   :  { %2692 = vmatprep.subr.bf16.mxu1 %v2845_v3 }
 0x1cc   :  { %2694 = vmatpush3.bf16.msra.mxu1 %v2693_v6 }
 0x1cd   :  { %2695 = vmatprep.subr.bf16.mxu1 %v2845_v3 }
 0x1d0   :  { %2697 = vmatpush3.bf16.msra.mxu1 %v2696_v7 }
 0x1d1   :  { %2698 = vmatprep.subr.bf16.mxu1 %v2845_v3 }
 0x1d4   :  { %2700 = vmatpush3.bf16.msra.mxu1 %v2699_v9 }
 0x1d5   :  { %2701 = vmatprep.subr.bf16.mxu1 %v2845_v3 }
 0x1d8   :  { %2703 = vmatpush3.bf16.msra.mxu1 %v2702_v33 }
 0x1d9   :  { %2704 = vmatprep.subr.bf16.mxu1 %v2845_v3 }
 0x1dc   :  { %2706 = vmatpush3.bf16.msra.mxu1 %v2705_v46 }
 0x1dd   :  { %2707 = vmatprep.subr.bf16.mxu1 %v2845_v3 }
 0x1e0   :  { %2709 = vmatpush3.bf16.msra.mxu1 %v2708_v57 }
 0x1e1   :  { %2710 = vmatprep.subr.bf16.mxu1 %v2845_v3 }
 0x1e4   :  { %2712 = vmatpush3.bf16.msra.mxu1 %v2711_v5 }
 0x1e5   :  { %2713 = vmatprep.subr.bf16.mxu1 %v2845_v3 }
 0x1e7   :  { %2360 = vmatmul.mubr.f32.vlgmr.msra.gmra.mrb[0].mxu1 %v782_v54 }
 0x1e8   :  { %2715 = vmatpush3.bf16.msra.mxu1 %v3111_v16  ;;  %2394 = vmatprep.mubr.msk.f32.mxu1 %vm2846_vm0, %v2847_v8 }
 0x1e9   :  { %2716 = vmatprep.subr.bf16.mxu1 %v2845_v3 }
 0x1ec   :  { %2718 = vmatpush3.bf16.msra.mxu1 %v3124_v53 }
 0x1ed   :  { %2719 = vmatprep.subr.bf16.mxu1 %v2845_v3 }
 0x1f0   :  { %2721 = vmatpush3.bf16.msra.mxu1 %v3146_v4 }
 0x1f1   :  { %2722 = vmatprep.subr.bf16.mxu1 %v2845_v3 }
 0x1f4   :  { %2724 = vmatpush3.bf16.msra.mxu1 %v3153_v25 }
 0x1f5   :  { %2725 = vmatprep.subr.bf16.mxu1 %v2845_v3 }
 0x1f8   :  { %2727 = vmatpush3.bf16.msra.mxu1 %v3160_v51 }
 0x1f9   :  { %2728 = vmatprep.subr.bf16.mxu1 %v2845_v3 }
 0x1fc   :  { %2730 = vmatpush3.bf16.msra.mxu1 %v3240_v38 }
 0x1fd   :  { %2731 = vmatprep.subr.bf16.mxu1 %v2845_v3 }
 0x200   :  { %2733 = vmatpush3.bf16.msra.mxu1 %v3250_v60 }
 0x201   :  { %2734 = vmatprep.subr.bf16.mxu1 %v2845_v3 }
 0x204   :  { %2736 = vmatpush3.bf16.msra.mxu1 %v3270_v37 }
 0x205   :  { %2737 = vmatprep.subr.bf16.mxu1 %v2845_v3 }
 0x207   :  { %2395 = vmatmul.mubr.f32.vlgmr.msra.gmra.mrb[0].mxu1 %v783_v28 }
 0x208   :  { %2739 = vmatpush3.bf16.msra.mxu1 %v2738_v23  ;;  %2429 = vmatprep.mubr.msk.f32.mxu1 %vm2846_vm0, %v2847_v8 }
 0x209   :  { %2740 = vmatprep.subr.bf16.mxu1 %v2845_v3 }
 0x20c   :  { %2742 = vmatpush3.bf16.msra.mxu1 %v2741_v41 }
 0x20d   :  { %2743 = vmatprep.subr.bf16.mxu1 %v2845_v3 }
 0x210   :  { %2745 = vmatpush3.bf16.msra.mxu1 %v2744_v61 }
 0x211   :  { %2746 = vmatprep.subr.bf16.mxu1 %v2845_v3 }
 0x214   :  { %2748 = vmatpush3.bf16.msra.mxu1 %v2747_v47 }
 0x215   :  { %2749 = vmatprep.subr.bf16.mxu1 %v2845_v3 }
 0x218   :  { %2751 = vmatpush3.bf16.msra.mxu1 %v2750_v48 }
 0x219   :  { %2752 = vmatprep.subr.bf16.mxu1 %v2845_v3 }
 0x21c   :  { %2754 = vmatpush3.bf16.msra.mxu1 %v2753_v56 }
 0x21d   :  { %2755 = vmatprep.subr.bf16.mxu1 %v2845_v3 }
 0x220   :  { %2757 = vmatpush3.bf16.msra.mxu1 %v2756_v43 }
 0x221   :  { %2758 = vmatprep.subr.bf16.mxu1 %v2845_v3 }
 0x224   :  { %2760 = vmatpush3.bf16.msra.mxu1 %v2759_v27 }
 0x225   :  { %2761 = vmatprep.subr.bf16.mxu1 %v2845_v3 }
 0x227   :  { %2430 = vmatmul.mubr.f32.vlgmr.msra.gmra.mrb[0].mxu1 %v3363_v55 }
 0x228   :  { %2763 = vmatpush3.bf16.msra.mxu1 %v3111_v16  ;;  %2464 = vmatprep.mubr.msk.f32.mxu1 %vm2846_vm0, %v2847_v8  ;;  %v1342_v16 = vld [vmem:[%s3509_s5] sm:$0xf] }
 0x229   :  { %2764 = vmatprep.subr.bf16.mxu1 %v2845_v3 }
 0x22c   :  { %2766 = vmatpush3.bf16.msra.mxu1 %v3124_v53  ;;  %v1349_v53 = vsel %vm1347_vm1, %v1342_v16, 0 }
 0x22d   :  { %2767 = vmatprep.subr.bf16.mxu1 %v2845_v3 }
 0x230   :  { %2769 = vmatpush3.bf16.msra.mxu1 %v3146_v4  ;;  %v1352_v4 = vand.u32 4294901760, %v1349_v53 }
 0x231   :  { %2770 = vmatprep.subr.bf16.mxu1 %v2845_v3 }
 0x232   :  { %2483 = vmatpush3.msra.mxu0 %v1352_v4 }
 0x233   :  { %2487 = vmatprep.subr.mxu0 %v2847_v8 }
 0x234   :  { %2772 = vmatpush3.bf16.msra.mxu1 %v3153_v25 }
 0x235   :  { %2773 = vmatprep.subr.bf16.mxu1 %v2845_v3 }
 0x238   :  { %2775 = vmatpush3.bf16.msra.mxu1 %v3160_v51 }
 0x239   :  { %2776 = vmatprep.subr.bf16.mxu1 %v2845_v3 }
 0x23c   :  { %2778 = vmatpush3.bf16.msra.mxu1 %v3240_v38  ;;  %v1429_v38 = vsub.f32 %v1349_v53, %v1352_v4 }
 0x23d   :  { %2779 = vmatprep.subr.bf16.mxu1 %v2845_v3 }
 0x23e   :  { %v1430_v1 = vand.u32 4294901760, %v1429_v38 }
 0x240   :  { %2781 = vmatpush3.bf16.msra.mxu1 %v3250_v60  ;;  %v1431_v35 = vsub.f32 %v1429_v38, %v1430_v1 }
 0x241   :  { %2782 = vmatprep.subr.bf16.mxu1 %v2845_v3 }
 0x242   :  { %v1432_v39 = vand.u32 4294901760, %v1431_v35 }
 0x244   :  { %2784 = vmatpush3.bf16.msra.mxu1 %v3270_v37 }
 0x245   :  { %2467 = vmatprep.subr.mxu1 %v2847_v8 }
 0x247   :  { %2465 = vmatmul.mubr.f32.vlgmr.msra.gmra.mrb[0].mxu1 %v3363_v55 }
 0x248   :  { %2469 = vmatprep.mubr.msk.f32.mxu1 %vm2846_vm0, %v2847_v8  ;;  %2468 = vmatpush3.msra.mxu1 %v1352_v4 }
 0x249   :  { %2472 = vmatprep.subr.mxu1 %v2847_v8 }
 0x31a   :  { %v1337_v3 = vpop.f32.mrb[0].mxu1 }
 0x31b   :  { %v2785_v25 = vadd.f32 1e-06, %v1337_v3  ;;  %v2466_v51 = vpop.f32.mrb[1].mxu1 }
 0x31d   :  { %2819 = vrsqrt.f32 %v2785_v25 }
 0x327   :  { %v2820_v60 = vpop.eup %2819 }
 0x328   :  { %v1345_v0 = vsel %vm1343_vm2, %v2820_v60, 0 }
 0x329   :  { %v1417_v2 = vand.u32 4294901760, %v1345_v0 }
 0x32b   :  { %v1418_v29 = vsub.f32 %v1345_v0, %v1417_v2 }
 0x32d   :  { %v1419_v36 = vand.u32 4294901760, %v1418_v29 }
 0x32f   :  { %2485 = vmatmul.mubr.f32.vlgmr.msra.gmra.mrb[2].mxu0 %v1419_v36  ;;  %v1420_v37 = vsub.f32 %v1418_v29, %v1419_v36 }
 0x330   :  { %2488 = vmatpush3.msra.mxu0 %v1430_v1  ;;  %2489 = vmatprep.mubr.msk.f32.mxu0 %vm2846_vm0, %v2847_v8 }
 0x331   :  { %v1421_v40 = vand.u32 4294901760, %v1420_v37  ;;  %2492 = vmatprep.subr.mxu0 %v2847_v8 }
 0x333   :  { %2470 = vmatmul.mubr.f32.vlgmr.msra.gmra.mrb[2].mxu1 %v1421_v40 }
 0x334   :  { %2473 = vmatpush3.msra.mxu1 %v1432_v39  ;;  %2474 = vmatprep.mubr.msk.f32.mxu1 %vm2846_vm0, %v2847_v8 }
 0x335   :  { %2477 = vmatprep.subr.mxu1 %v2847_v8 }
 0x337   :  { %2490 = vmatmul.mubr.f32.vlgmr.msra.gmra.mrb[2].mxu0 %v1417_v2 }
 0x338   :  { %2493 = vmatpush3.msra.mxu0 %v1352_v4  ;;  %2494 = vmatprep.mubr.msk.f32.mxu0 %vm2846_vm0, %v2847_v8 }
 0x33b   :  { %2475 = vmatmul.mubr.f32.vlgmr.msra.gmra.mrb[2].mxu1 %v1417_v2 }
 0x33c   :  { %2478 = vmatpush3.msra.mxu1 %v1429_v38  ;;  %2479 = vmatprep.mubr.msk.f32.mxu1 %vm2846_vm0, %v2847_v8 }
 0x33f   :  { %2495 = vmatmul.mubr.f32.vlgmr.msra.gmra.mrb[2].mxu0 %v1417_v2 }
 0x343   :  { %2480 = vmatmul.mubr.f32.vlgmr.msra.gmra.mrb[2].mxu1 %v1418_v29 }
 0x412   :  { %v1793_v10 = vpop.f32.mrb[2].mxu0 }
 0x413   :  { %v2496_v11 = vpop.f32.mrb[3].mxu0 }
 0x416   :  { %v1573_v17 = vpop.f32.mrb[2].mxu1 }
 0x417   :  { %v2786_v49 = vadd.f32 %v1793_v10, %v1573_v17  ;;  %v2481_v21 = vpop.f32.mrb[3].mxu1 }
 0x419   :  { %v1797_v50 = vmul.f32 %v2786_v49, %v3359_v12 }
 0x41b   :  { %v1805_v8 = vmul.f32 %v1829_v24, %v1797_v50 }
 0x41d   :  { %v1813_v18 = vadd.f32 %v1830_v52, %v1805_v8 }
 0x41f   :  { %1814 = vst [vmem:[#allocation2] sm:$0xf] %v1813_v18 }
 0x420   :  { %2832 = shalt.err (!%p2829_p4)
}
 0x421   :  { %s2833_s19 = scalar_lea.hbm %s3510_s6, 64 }
 0x422   :  { %p2834_p5 = scmp.ne.s32.totalorder %s3510_s6, %s2833_s19  ;;  %p2837_p6 = scmp.lt.u32.totalorder %s2833_s19, %s3510_s6 }
 0x424   :  { %p2839_p7 = pnand %p2837_p6, %p2834_p5 }
 0x426   :  { %2842 = shalt.err (!%p2839_p7)
}
 0x427   :  { %1824 = dma.vmem_to_hbm [thread:$0]  %s1822_s16, 64, %s3510_s6, [#allocation3]  }
 0x428   :  { %2843 = dma.done.wait [#allocation3], 64  }
 0x429   :  { %2844 = vsyncadd [#allocation3], 4294967232 }
 0x42a   :  { %1828 = vsyncpa [#allocation3], 1 }

</bundles_post_ra>
